<compile_context>
chip_gen: v7x
topology: tpu7x:2x2x1
jax: 0.10.0
libtpu: 0.0.40
codegen_flags: <defaults>
</compile_context>

<pallas_src>
import math

import jax
import jax.numpy as jnp
from jax.experimental import pallas as pl
from jax.experimental.pallas import tpu as pltpu


# ----------------------------- spatial shift (plain JAX, fused under jit) ---
# TODO(synk): optionally fuse the shift into the kernel (per-tile +/-W halo +
# pltpu.roll + channel-quarter masks) to drop its extra HBM read+write pass.
def spatial_shift(x):
    """Replicates the PyTorch slice assignments exactly.  In the reference the
    writes go into x.clone() while every RHS reads the *original* x, so reading
    `x` on every RHS and applying the .set()s in order is bit-exact — including
    the overlapping C == 1 branch."""
    B, C, H, W = x.shape
    xs = x
    if C == 1:
        h_mid, w_mid = H // 2, W // 2
        xs = xs.at[:, :, :h_mid, :-1].set(x[:, :, :h_mid, 1:])
        xs = xs.at[:, :, :h_mid, 1:].set(x[:, :, :h_mid, :-1])
        xs = xs.at[:, :, :-1, :w_mid].set(x[:, :, 1:, :w_mid])
        xs = xs.at[:, :, 1:, w_mid:].set(x[:, :, :-1, w_mid:])
    else:
        cs = max(1, C // 4)
        end0 = min(cs, C)
        xs = xs.at[:, :end0, :, 1:].set(x[:, :end0, :, :-1])              # shift right (W)
        if C >= 2:
            end1 = min(cs * 2, C)
            xs = xs.at[:, cs:end1, :, :-1].set(x[:, cs:end1, :, 1:])      # shift left (W)
        if C >= 3:
            end2 = min(cs * 3, C)
            xs = xs.at[:, cs * 2:end2, 1:, :].set(x[:, cs * 2:end2, :-1, :])  # shift down (H)
        if C >= 4:
            xs = xs.at[:, cs * 3:, :-1, :].set(x[:, cs * 3:, 1:, :])      # shift up (H)
    return xs


# ----------------------------- Pallas MLP kernel (NCHW / lane-dense HW) -----
def _gelu_exact(x):
    # torch.nn.GELU() default: 0.5 * x * (1 + erf(x / sqrt(2)))
    # (kept exact-erf in f32 on all generations to preserve torch semantics)
    return 0.5 * x * (1.0 + jax.lax.erf(x * (1.0 / math.sqrt(2.0))))


def _mlp_kernel(x_ref, w1_ref, b1_ref, w2_ref, b2_ref, o_ref):
    x = x_ref[...]                                                     # (C, T)
    h = jnp.dot(w1_ref[...], x, preferred_element_type=jnp.float32)   # (hid, T)
    h = _gelu_exact(h + b1_ref[...])                                   # bias: lane broadcast
    y = jnp.dot(w2_ref[...], h, preferred_element_type=jnp.float32)   # (out, T)
    o_ref[...] = (y + b2_ref[...]).astype(o_ref.dtype)                 # lane-dense store


# ----------------------------- tiling / VMEM planning -----------------------
def _round_up(v, m):
    return ((v + m - 1) // m) * m


def _vmem_capacity_bytes():
    try:
        return int(pltpu.get_tpu_info().vmem_capacity_bytes)
    except Exception:
        return 64 * 1024 * 1024          # conservative (v7x-sized) fallback


def _tile_working_set(t, c, hid, out):
    """f32 VMEM bytes for one lane tile, counting sublane padding to 8:
    double-buffered x/out tiles + the (hid, t) hidden temporary."""
    return 4 * t * (2 * _round_up(c, 8) + 2 * _round_up(out, 8) + _round_up(hid, 8))


def _weights_vmem_bytes(c, hid, out):
    # resident, double-buffered, (sublane, lane) padded to (8, 128)
    return 4 * 2 * (_round_up(hid, 8) * _round_up(c, 128)
                    + _round_up(hid, 8) * 128
                    + _round_up(out, 8) * _round_up(hid, 128)
                    + _round_up(out, 8) * 128)


def _choose_tile_hw(hw, batch, c, hid, out):
    """Largest lane tile (multiple of 128, up to 64K) whose working set fits a
    generation-aware VMEM budget, preferring >= 4 total grid steps so both v7x
    TensorCores get work under dimension_semantics=('parallel','parallel')."""
    if hw <= 128:
        return hw                                    # full-dim block
    vmem_cap = _vmem_capacity_bytes()
    budget = min((vmem_cap * 2) // 5, 48 * 1024 * 1024)   # ~25 MiB v7x, 48 MiB v5e/v6e
    max_t = _round_up(hw, 128)
    cands = [t for t in (65536, 32768, 16384, 8192, 4096, 2048, 1024, 512, 256, 128)
             if t <= max_t]
    fitting = [t for t in cands
               if _tile_working_set(t, c, hid, out) + (1 << 20) <= budget]
    for t in fitting:                                 # descending
        if batch * (-(-hw // t)) >= 4:                # >= 2 steps per v7x TensorCore
            return t
    return fitting[0] if fitting else 128


def _run_mlp(x3, w1, b1, w2, b2, *, tile_hw):
    batch, c, hw = x3.shape
    hid = w1.shape[0]
    out = w2.shape[0]
    n_tiles = -(-hw // tile_hw)           # ragged last tile: masked boundary stores

    vmem_cap = _vmem_capacity_bytes()
    need = _tile_working_set(tile_hw, c, hid, out) + _weights_vmem_bytes(c, hid, out)
    vmem_limit = int(min(max(need + (8 << 20), 32 << 20), (vmem_cap * 3) // 4))

    cost = pl.CostEstimate(
        flops=2 * batch * hw * (c * hid + hid * out),
        transcendentals=batch * hw * hid,   # advisory only: erf lowers to a VALU poly
        bytes_accessed=4 * (batch * hw * (c + out) + c * hid + hid + hid * out + out),
    )

    return pl.pallas_call(
        _mlp_kernel,
        out_shape=jax.ShapeDtypeStruct((batch, out, hw), x3.dtype),
        grid_spec=pltpu.PrefetchScalarGridSpec(
            num_scalar_prefetch=0,
            grid=(batch, n_tiles),
            in_specs=[
                pl.BlockSpec((pl.Squeezed(), c, tile_hw), lambda b, i: (b, 0, i)),  # X tile
                pl.BlockSpec((hid, c), lambda b, i: (0, 0)),      # W1 (resident)
                pl.BlockSpec((hid, 1), lambda b, i: (0, 0)),      # b1
                pl.BlockSpec((out, hid), lambda b, i: (0, 0)),    # W2 (resident)
                pl.BlockSpec((out, 1), lambda b, i: (0, 0)),      # b2
            ],
            out_specs=pl.BlockSpec((pl.Squeezed(), out, tile_hw), lambda b, i: (b, 0, i)),
        ),
        compiler_params=pltpu.CompilerParams(
            dimension_semantics=("parallel", "parallel"),
            vmem_limit_bytes=vmem_limit,
        ),
        cost_estimate=cost,
    )(x3, w1, b1, w2, b2)


# ----------------------------- full forward (jitted) ------------------------
@jax.jit
def spatial_shift_mlp(x, w1, b1, w2, b2):
    """x: (B, C, H, W) f32; w1: (hid, C), b1: (hid, 1), w2: (out, hid),
    b2: (out, 1)  (torch nn.Linear layout)  ->  (B, out, H, W) f32."""
    B, C, H, W = x.shape
    hid = w1.shape[0]
    out_features = w2.shape[0]
    hw = H * W

    xs = spatial_shift(x)
    x3 = xs.reshape(B, C, hw)                                 # free view of NCHW
    tile_hw = _choose_tile_hw(hw, B, C, hid, out_features)
    y3 = _run_mlp(x3, w1, b1, w2, b2, tile_hw=tile_hw)        # (B, out, hw)
    return y3.reshape(B, out_features, H, W)                  # free reshape


# ----------------------------- reference (plain JAX) ------------------------
def _reference(x, w1, b1, w2, b2):
    B, C, H, W = x.shape
    xs = spatial_shift(x)
    t = jnp.transpose(xs, (0, 2, 3, 1)).reshape(B * H * W, C)
    h = _gelu_exact(t @ w1.T + b1[:, 0])
    y = h @ w2.T + b2[:, 0]
    return jnp.transpose(y.reshape(B, H, W, -1), (0, 3, 1, 2))


if __name__ == "__main__":
    key = jax.random.PRNGKey(0)
    kx, k1, k2, k3, k4 = jax.random.split(key, 5)

    # Small shapes consistent with the module's forward.
    B, C, H, W = 2, 4, 16, 16
    in_features = C
    hidden_features = 32
    out_features = in_features  # module default: out_features or in_features

    x = jax.random.normal(kx, (B, C, H, W), dtype=jnp.float32)

    # Parameters in native torch nn.Linear layout (out_features, in_features).
    w1 = jax.random.normal(k1, (hidden_features, in_features), jnp.float32) / math.sqrt(in_features)
    b1 = jax.random.normal(k2, (hidden_features, 1), jnp.float32) * 0.01
    w2 = jax.random.normal(k3, (out_features, hidden_features), jnp.float32) / math.sqrt(hidden_features)
    b2 = jax.random.normal(k4, (out_features, 1), jnp.float32) * 0.01

    y = spatial_shift_mlp(x, w1, b1, w2, b2)
    y = jax.block_until_ready(y)

    assert y.shape == (B, out_features, H, W)
    assert y.dtype == jnp.float32
    y_ref = _reference(x, w1, b1, w2, b2)
    assert jnp.allclose(y, y_ref, atol=2e-3, rtol=2e-3), float(jnp.max(jnp.abs(y - y_ref)))
    print("KERNEL_OK")
</pallas_src>

<mosaic_0001>
module attributes {stable_mosaic.version = 11 : i64} {
  func.func @_mlp_kernel(%arg0: i32, %arg1: i32, %arg2: memref<1x4x128xf32, #tpu.memory_space<vmem>>, %arg3: memref<32x4xf32, #tpu.memory_space<vmem>>, %arg4: memref<32x1xf32, #tpu.memory_space<vmem>>, %arg5: memref<4x32xf32, #tpu.memory_space<vmem>>, %arg6: memref<4x1xf32, #tpu.memory_space<vmem>>, %arg7: memref<1x4x128xf32, #tpu.memory_space<vmem>>) attributes {dimension_semantics = [#tpu.dimension_semantics<parallel>, #tpu.dimension_semantics<parallel>], iteration_bounds = array<i64: 2, 2>, scalar_prefetch = 0 : i64, scratch_operands = 0 : i64, tpu.core_type = #tpu.core_type<tc>, window_params = [{transform_indices = @transform_0, window_bounds = array<i64: 1, 4, 128>}, {pipeline_mode = #tpu.pipeline_mode<synchronous>, transform_indices = @transform_1, window_bounds = array<i64: 32, 4>}, {pipeline_mode = #tpu.pipeline_mode<synchronous>, transform_indices = @transform_2, window_bounds = array<i64: 32, 1>}, {pipeline_mode = #tpu.pipeline_mode<synchronous>, transform_indices = @transform_3, window_bounds = array<i64: 4, 32>}, {pipeline_mode = #tpu.pipeline_mode<synchronous>, transform_indices = @transform_4, window_bounds = array<i64: 4, 1>}, {transform_indices = @transform_5, window_bounds = array<i64: 1, 4, 128>}]} {
    %c0 = arith.constant 0 : index
    %c0_0 = arith.constant 0 : index
    %c0_1 = arith.constant 0 : index
    %0 = vector.load %arg2[%c0, %c0_0, %c0_1] : memref<1x4x128xf32, #tpu.memory_space<vmem>>, vector<1x4x128xf32>
    %1 = vector.shape_cast %0 : vector<1x4x128xf32> to vector<4x128xf32>
    %c0_2 = arith.constant 0 : index
    %c0_3 = arith.constant 0 : index
    %2 = vector.load %arg3[%c0_2, %c0_3] : memref<32x4xf32, #tpu.memory_space<vmem>>, vector<32x4xf32>
    %cst = arith.constant dense<0.000000e+00> : vector<32x128xf32>
    %3 = tpu.matmul %2, %1, %cst {dimension_numbers = #tpu.dot_dimension_numbers<[1], [0], [0], [1], [0, 0, 1, 1], [], []>} : vector<32x4xf32>, vector<4x128xf32>, vector<32x128xf32> -> vector<32x128xf32>
    %c0_4 = arith.constant 0 : index
    %c0_5 = arith.constant 0 : index
    %4 = vector.load %arg4[%c0_4, %c0_5] : memref<32x1xf32, #tpu.memory_space<vmem>>, vector<32x1xf32>
    %5 = vector.broadcast %4 : vector<32x1xf32> to vector<32x128xf32>
    %6 = arith.addf %3, %5 : vector<32x128xf32>
    %cst_6 = arith.constant 5.000000e-01 : f32
    %7 = vector.broadcast %cst_6 : f32 to vector<32x128xf32>
    %8 = arith.mulf %7, %6 : vector<32x128xf32>
    %cst_7 = arith.constant 0.707106769 : f32
    %9 = vector.broadcast %cst_7 : f32 to vector<32x128xf32>
    %10 = arith.mulf %6, %9 : vector<32x128xf32>
    %11 = math.erf %10 : vector<32x128xf32>
    %cst_8 = arith.constant 1.000000e+00 : f32
    %12 = vector.broadcast %cst_8 : f32 to vector<32x128xf32>
    %13 = arith.addf %12, %11 : vector<32x128xf32>
    %14 = arith.mulf %8, %13 : vector<32x128xf32>
    %c0_9 = arith.constant 0 : index
    %c0_10 = arith.constant 0 : index
    %15 = vector.load %arg5[%c0_9, %c0_10] : memref<4x32xf32, #tpu.memory_space<vmem>>, vector<4x32xf32>
    %cst_11 = arith.constant dense<0.000000e+00> : vector<4x128xf32>
    %16 = tpu.matmul %15, %14, %cst_11 {dimension_numbers = #tpu.dot_dimension_numbers<[1], [0], [0], [1], [0, 0, 1, 1], [], []>} : vector<4x32xf32>, vector<32x128xf32>, vector<4x128xf32> -> vector<4x128xf32>
    %c0_12 = arith.constant 0 : index
    %c0_13 = arith.constant 0 : index
    %17 = vector.load %arg6[%c0_12, %c0_13] : memref<4x1xf32, #tpu.memory_space<vmem>>, vector<4x1xf32>
    %18 = vector.broadcast %17 : vector<4x1xf32> to vector<4x128xf32>
    %19 = arith.addf %16, %18 : vector<4x128xf32>
    %c0_14 = arith.constant 0 : index
    %c0_15 = arith.constant 0 : index
    %c0_16 = arith.constant 0 : index
    %20 = vector.load %arg7[%c0_14, %c0_15, %c0_16] : memref<1x4x128xf32, #tpu.memory_space<vmem>>, vector<1x4x128xf32>
    %21 = vector.shape_cast %20 : vector<1x4x128xf32> to vector<4x128xf32>
    %22 = vector.shape_cast %19 : vector<4x128xf32> to vector<1x4x128xf32>
    tpu.vector_store %arg7[%c0_14, %c0_15, %c0_16], %22 {strides = array<i32>} : memref<1x4x128xf32, #tpu.memory_space<vmem>>, vector<1x4x128xf32>,
    return
  }
  func.func @transform_0(%arg0: i32, %arg1: i32) -> (i32, i32, i32) {
    %c0_i32 = arith.constant 0 : i32
    %c0_i32_0 = arith.constant 0 : i32
    return %arg0, %c0_i32, %arg1 : i32, i32, i32
  }
  func.func @transform_1(%arg0: i32, %arg1: i32) -> (i32, i32) {
    %c0_i32 = arith.constant 0 : i32
    %c0_i32_0 = arith.constant 0 : i32
    %c0_i32_1 = arith.constant 0 : i32
    return %c0_i32, %c0_i32_0 : i32, i32
  }
  func.func @transform_2(%arg0: i32, %arg1: i32) -> (i32, i32) {
    %c0_i32 = arith.constant 0 : i32
    %c0_i32_0 = arith.constant 0 : i32
    %c0_i32_1 = arith.constant 0 : i32
    return %c0_i32, %c0_i32_0 : i32, i32
  }
  func.func @transform_3(%arg0: i32, %arg1: i32) -> (i32, i32) {
    %c0_i32 = arith.constant 0 : i32
    %c0_i32_0 = arith.constant 0 : i32
    %c0_i32_1 = arith.constant 0 : i32
    return %c0_i32, %c0_i32_0 : i32, i32
  }
  func.func @transform_4(%arg0: i32, %arg1: i32) -> (i32, i32) {
    %c0_i32 = arith.constant 0 : i32
    %c0_i32_0 = arith.constant 0 : i32
    %c0_i32_1 = arith.constant 0 : i32
    return %c0_i32, %c0_i32_0 : i32, i32
  }
  func.func @transform_5(%arg0: i32, %arg1: i32) -> (i32, i32, i32) {
    %c0_i32 = arith.constant 0 : i32
    %c0_i32_0 = arith.constant 0 : i32
    return %arg0, %c0_i32, %arg1 : i32, i32, i32
  }
}

</mosaic_0001>

<bundles_post_ra>
// kernel: spatial_shift_mlp.1
= control target key start
LH: loop header
LB: loop body
LE: loop exit
PB: predicated region body
PF: predicated region fallthrough
CT: control target
= control target key end

     0   :  { %s755_s18 = smov 0   ;;  %s757_s19 = smov 0   ;;  %s847_s0 = inlined_call_operand.vmem [shape: f32[2,4,256], index: 0, kind: input, shape index: {}]   ;;  %s848_s1 = inlined_call_operand.vmem [shape: f32[32,4], index: 1, kind: input, shape index: {}]   ;;  %s849_s2 = inlined_call_operand.vmem [shape: f32[32,1], index: 2, kind: input, shape index: {}]   ;;  %s850_s3 = inlined_call_operand.vmem [shape: f32[4,32], index: 3, kind: input, shape index: {}]   ;;  %s851_s4 = inlined_call_operand.vmem [shape: f32[4,1], index: 4, kind: input, shape index: {}]   ;;  %s852_s5 = inlined_call_operand.vmem [shape: f32[2,4,256], index: 5, kind: output, shape index: {}]  }
   0x1   :  { %s759_s20 = smov 0   ;;  %s761_s21 = smov 0  }
   0x2   :  { %s763_s22 = smov 0  }
   0x3 LB: > { %s24_s23 = sadd.s32 1, %s711_s20  ;;  %s27_s24 = sadd.s32 1, %s715_s21  ;;  %s719_s22 = sphi %s763_s22, %s15_s22   ;;  %s715_s21 = sphi %s761_s21, %s856_s21   ;;  %s711_s20 = sphi %s759_s20, %s855_s20   ;;  %s707_s19 = sphi %s757_s19, %s854_s19   ;;  %s703_s18 = sphi %s755_s18, %s853_s18  }
   0x4   : > { %p25_p0 = scmp.ge.s32.totalorder %s24_s23, 2  ;;  %p579_p1 = scmp.ge.s32.totalorder %s719_s22, 1 }
   0x5   : > { %p206_p2 = scmp.lt.s32.totalorder %s719_s22, 5 }
   0x6   : > { %s858_s23 = smov (%p25_p0, %s24_s23), 0  ;;  %s860_s24 = smov (!%p25_p0, %s27_s24), %s715_s21 }
   0x7   : > { %p207_p3 = pnand %p579_p1, %p206_p2  ;;  %p29_p4 = scmp.ge.s32.totalorder %s860_s24, 2 }
   0x8   : > { %p240_p5 = scmp.lt.s32.totalorder (!%p207_p3), %s707_s19, 1  ;;  %p242_p6 = scmp.lt.s32.totalorder (!%p207_p3), %s703_s18, 1  ;;  %v257_v0 = vld [vmem:[%s848_s1] sm:$0xff] (!%p207_p3)  ;;  %vm285_vm0 = vcmask (!%p207_p3), 31744   ;;  %v721_v2 = vmov (!%p207_p3), 0   ;;  %v263_v3 = vld [vmem:[%s849_s2 + $0x10] sm:$0xff] (!%p207_p3) }
   0x9   : > { %s862_s24 = smov (%p29_p4, %s860_s24), 0  ;;  %210 = sbr.rel (%p207_p3) target bundleno = 480 (0x1e0), region = 40 }
   0xa   : > { %604 = vmatprep.mubr.msk.f32.mxu0 (!%p207_p3), %vm285_vm0, %v257_v0  ;;  %v261_v1 = vld [vmem:[%s849_s2] sm:$0xff] (!%p207_p3)  ;;  %671 = vset.pattern.permute.xlu0 (!%p207_p3), %v721_v2  ;;  %v262_v4 = vld [vmem:[%s849_s2 + $0x8] sm:$0xff] (!%p207_p3)  ;;  %v264_v5 = vld [vmem:[%s849_s2 + $0x18] sm:$0xff] (!%p207_p3)  ;;  %vm298_vm1 = vcmask (!%p207_p3), 1043456   ;;  %v722_v11 = vmov (!%p207_p3), 0.0|0.0   ;;  %vm723_vm2 = vmmov (!%p207_p3), 0  }
   0xb   : > { %672 = vset.pattern.permute.xlu1 (!%p207_p3), %v721_v2  ;;  %267 = vperm.xlu0 (!%p207_p3), %671, %v261_v1   ;;  %v258_v7 = vld [vmem:[%s848_s1 + $0x8] sm:$0xff] (!%p207_p3)  ;;  %v408_v8 = vld [vmem:[%s851_s4] sm:$0xf] (!%p207_p3)  ;;  %v259_v9 = vld [vmem:[%s848_s1 + $0x10] sm:$0xff] (!%p207_p3)  ;;  %v724_v12 = vmov (!%p207_p3), 0.0   ;;  %vm414_vm3 = vcmask (!%p207_p3), 261120  }
   0xc   : > { %277 = vperm.xlu1 (!%p207_p3), %672, %v263_v3   ;;  %v260_v10 = vld [vmem:[%s848_s1 + $0x18] sm:$0xff] (!%p207_p3)  ;;  %621 = vmatprep.subr.bf16.mxu1 (!%p207_p3), %v722_v11  ;;  %v407_v47 = vld [vmem:[%s850_s3] sm:$0xf] (!%p207_p3) }
   0xd   : > { %618 = vmatprep.mubr.msk.f32.mxu1 (!%p207_p3), %vm723_vm2, %v724_v12 }
   0xf   : > { %272 = vperm.xlu0 (!%p207_p3), %671, %v262_v4  }
  0x10   : > { %s864_s19 = smov (!%p240_p5, %s707_s19), 1  ;;  %s866_s18 = smov (!%p242_p6, %s703_s18), 1  ;;  %282 = vperm.xlu1 %672, %v264_v5  }
  0x11   : > { %s580_s6 = sshll.u32 %s864_s19, 1 }
  0x12   : > { %s801_s11 = sadd.s32 %s580_s6, %s866_s18 }
  0x13   : > { %s581_s12 = sshll.u32 %s801_s11, 2  ;;  %411 = vperm.xlu0 %671, %v408_v8  }
  0x14   : > { %s247_s15 = scalar_lea.vmem %s847_s0, %s581_s12  ;;  %s255_s8 = scalar_lea.vmem %s852_s5, %s581_s12 }
  0x15   : > { %v256_v6 = vld [vmem:[%s247_s15] sm:$0xf] }
  0x16   : > { %602 = vmatprep.subr.msk.mxu0 %vm298_vm1, %v256_v6 }
  0x17   : > { %603 = vmatpush3.msk.msra.mxu0 %vm298_vm1, %v256_v6 }
  0x18   : > { %605 = vmatmul.mubr.msk.f32.vlgmr.msra.gmra.mrb[0].mxu0 %vm285_vm0, %v258_v7 }
  0x19   : > { %607 = vmatprep.mubr.msk.f32.mxu0 %vm285_vm0, %v259_v9 }
  0x1c   : > { %608 = vmatmul.mubr.msk.f32.gmra.mrb[2].mxu0 %vm285_vm0, %v260_v10 }
  0x8a   : > { %v268_v13 = vpop.permute.xlu0 %267 }
  0x8b   : > { %v278_v14 = vpop.permute.xlu1 %277 }
  0x8e   : > { %v273_v15 = vpop.permute.xlu0 %272 }
  0x8f   : > { %v283_v21 = vpop.permute.xlu1 %282 }
  0x92   : > { %v412_v48 = vpop.permute.xlu0 %411 }
  0xeb   : > { %v606_v16 = vpop.f32.mrb[0].mxu0 }
  0xec   : > { %v374_v17 = vadd.f32 %v606_v16, %v273_v15  ;;  %v368_v18 = vpop.f32.mrb[1].mxu0 }
  0xed   : > { %v369_v19 = vadd.f32 %v368_v18, %v268_v13 }
  0xee   : > { %v392_v20 = vmul.f32 0.70710677, %v374_v17  ;;  %v388_v31 = vmul.f32 0.5, %v374_v17 }
  0xef   : > { %v391_v22 = vmul.f32 0.70710677, %v369_v19  ;;  %v609_v23 = vpop.f32.mrb[2].mxu0  ;;  %v387_v33 = vmul.f32 0.5, %v369_v19 }
  0xf0   : > { %673 = verf.f32 %v392_v20  ;;  %v384_v24 = vadd.f32 %v609_v23, %v283_v21  ;;  %v378_v25 = vpop.f32.mrb[3].mxu0 }
  0xf1   : > { %675 = verf.f32 %v391_v22  ;;  %v379_v26 = vadd.f32 %v378_v25, %v278_v14 }
  0xf2   : > { %v394_v27 = vmul.f32 0.70710677, %v384_v24  ;;  %v390_v39 = vmul.f32 0.5, %v384_v24 }
  0xf3   : > { %v393_v28 = vmul.f32 0.70710677, %v379_v26  ;;  %v389_v41 = vmul.f32 0.5, %v379_v26 }
  0xf4   : > { %677 = verf.f32 %v394_v27 }
  0xf5   : > { %679 = verf.f32 %v393_v28 }
  0xfa   : > { %v674_v29 = vpop.eup %673 }
  0xfb   : > { %v676_v30 = vpop.eup %675  ;;  %v400_v32 = vadd.f32 1.0, %v674_v29 }
  0xfc   : > { %v399_v34 = vadd.f32 1.0, %v676_v30 }
  0xfd   : > { %v404_v35 = vmul.f32 %v400_v32, %v388_v31 }
  0xfe   : > { %v678_v36 = vpop.eup %677  ;;  %v403_v37 = vmul.f32 %v399_v34, %v387_v33 }
  0xff   : > { %v680_v38 = vpop.eup %679  ;;  %v402_v40 = vadd.f32 1.0, %v678_v36 }
 0x100   : > { %v401_v42 = vadd.f32 1.0, %v680_v38  ;;  %v622_v43 = vpack.c.bf16 %v404_v35, %v403_v37 }
 0x101   : > { %v406_v44 = vmul.f32 %v402_v40, %v390_v39 }
 0x102   : > { %v405_v45 = vmul.f32 %v401_v42, %v389_v41  ;;  %623 = vmatpush3.bf16.msra.mxu1 %v622_v43 }
 0x103   : > { %624 = vmatprep.subr.bf16.mxu1 %v722_v11 }
 0x104   : > { %v625_v46 = vpack.c.bf16 %v406_v44, %v405_v45 }
 0x106   : > { %626 = vmatpush3.bf16.msra.mxu1 %v625_v46 }
 0x109   : > { %619 = vmatmul.mubr.msk.f32.vlgmr.msra.gmra.mrb[0].mxu1 %vm414_vm3, %v407_v47 }
 0x1dc   : > { %v484_v49 = vpop.f32.mrb[0].mxu1 }
 0x1dd   : > { %v485_v50 = vadd.f32 %v484_v49, %v412_v48  ;;  %v620_v51 = vpop.f32.mrb[1].mxu1 }
 0x1df   : > { %488 = vst [vmem:[%s255_s8] sm:$0xf] %v485_v50 }
 0x1e0 PF: > { %s15_s22 = sadd.s32 1, %s719_s22   ;;  %s853_s18 = smov %s711_s20 }
 0x1e1   : > { %p12_p7 = scmp.ge.s32.totalorder %s15_s22, 6   ;;  %s854_s19 = smov %s715_s21 }
 0x1e2   : > { %s855_s20 = smov %s858_s23  ;;  %s856_s21 = smov %s862_s24 }
 0x1e3   :  { %14 = sbr.rel (!%p12_p7) target bundleno = 3 (0x3), region = 70 }

</bundles_post_ra>
